<compile_context>
chip_gen: v7x
topology: tpu7x:2x2x1
jax: 0.10.0
libtpu: 0.0.40
codegen_flags: <defaults>
</compile_context>

<pallas_src>
import functools

import jax
import jax.numpy as jnp
from jax.experimental import pallas as pl
from jax.experimental.pallas import tpu as pltpu

_EPS = 1e-5
_FAST_PATH_BYTES = 1 << 20  # below this, skip the Pallas kernel entirely


# ----------------------------------------------------------------------------- #
# Kernels
# ----------------------------------------------------------------------------- #
def _insnorm1d_kernel(x_ref, o_ref):
    """Row-resident path: one (TB, n) tile, full row per block, two-pass stats."""
    x = x_ref[...].astype(jnp.float32)
    inv_n = jnp.float32(1.0 / x.shape[-1])
    mean = jnp.sum(x, axis=-1, keepdims=True) * inv_n
    centered = x - mean
    var = jnp.sum(centered * centered, axis=-1, keepdims=True) * inv_n
    rstd = jax.lax.rsqrt(var + jnp.float32(_EPS))  # EUP op -- essentially free
    if o_ref.dtype == jnp.bfloat16:
        # Native bf16 VPU on v6e/v7x: halves live vreg/VMEM bytes for the block.
        o_ref[...] = (x_ref[...] - mean.astype(jnp.bfloat16)) * rstd.astype(jnp.bfloat16)
    else:
        o_ref[...] = (centered * rstd).astype(o_ref.dtype)


def _stats_kernel(x_ref, mean_ref, rstd_ref, *, n, tn):
    """Lane-tiled path, pass 1: accumulate per-row sum / sumsq across lane tiles.

    mean_ref / rstd_ref are (TB, 1) accumulator outputs (constant block index
    along the lane grid axis); finalized into (mean, 1/sqrt(var+eps)) on the
    last lane step.
    """
    j = pl.program_id(1)

    @pl.when(j == 0)
    def _():
        mean_ref[...] = jnp.zeros_like(mean_ref)
        rstd_ref[...] = jnp.zeros_like(rstd_ref)

    x = x_ref[...].astype(jnp.float32)
    # Mask the padded region of a partial final lane tile.
    col = j * tn + jax.lax.broadcasted_iota(jnp.int32, x.shape, 1)
    x = jnp.where(col < n, x, 0.0)
    mean_ref[...] += jnp.sum(x, axis=-1, keepdims=True)
    rstd_ref[...] += jnp.sum(x * x, axis=-1, keepdims=True)

    @pl.when(j == pl.num_programs(1) - 1)
    def _():
        inv_n = jnp.float32(1.0 / n)
        s = mean_ref[...]
        sq = rstd_ref[...]
        mean = s * inv_n
        var = jnp.maximum(sq * inv_n - mean * mean, 0.0)
        mean_ref[...] = mean
        rstd_ref[...] = jax.lax.rsqrt(var + jnp.float32(_EPS))


def _normalize_kernel(x_ref, mean_ref, rstd_ref, o_ref):
    """Lane-tiled path, pass 2: elementwise normalize with precomputed stats."""
    x = x_ref[...].astype(jnp.float32)
    o_ref[...] = ((x - mean_ref[...]) * rstd_ref[...]).astype(o_ref.dtype)


# ----------------------------------------------------------------------------- #
# Sizing
# ----------------------------------------------------------------------------- #
def _sublane_pack(itemsize: int) -> int:
    return {4: 8, 2: 16, 1: 32}.get(itemsize, 8)


def _device_budgets(itemsize: int):
    """(per-block byte target, vmem_limit_bytes), derived from the TPU generation."""
    try:
        info = pltpu.get_tpu_info()
        vmem_cap = int(getattr(info, "vmem_capacity_bytes", 0)) or (128 << 20)
    except Exception:  # non-TPU tracing / API drift: safe defaults
        vmem_cap = 128 << 20
    # 48 MiB on v7x (64 MiB/TC physical), 64 MiB on v5e/v6e (128 MiB physical).
    vmem_limit = min((3 * vmem_cap) // 4, 64 << 20)
    # Budget: 2 in + 2 out double-buffered blocks plus ~2 block-sized f32
    # temporaries inside the kernel (4/itemsize x block bytes each).
    denom = 4 + 2 * max(1, 4 // itemsize)
    target = max(vmem_limit // denom, 512 << 10)
    return target, vmem_limit


def _choose_tiles(bs: int, n: int, itemsize: int, target_bytes: int):
    """Returns (tb, tn). tn == n -> row-resident path; tn < n -> lane-tiled path."""
    pack = _sublane_pack(itemsize)
    row_bytes = n * itemsize
    min_rows = bs if bs <= pack else pack

    if min_rows * row_bytes <= target_bytes:
        # Row-resident: full row on the lane axis, tile the batch (sublane) axis.
        if bs <= pack:
            return bs, n
        rows = max(pack, (target_bytes // row_bytes) // pack * pack)
        # Guarantee >= 2 grid steps when bs >= 2*pack (megacore + pipeline overlap).
        half = (((bs + 1) // 2) + pack - 1) // pack * pack
        rows = min(rows, half)
        return rows, n

    # Lane-tiled: rows stay at the sublane pack, the lane axis carries the volume.
    tb = min_rows
    tn = max(128, (target_bytes // (tb * itemsize)) // 128 * 128)
    if tn >= n:
        return tb, n
    return tb, tn


# ----------------------------------------------------------------------------- #
# Wrapper
# ----------------------------------------------------------------------------- #
def _reference(weights: jax.Array) -> jax.Array:
    """Plain-JAX two-pass reference (same math as torch.nn.InstanceNorm1d(1))."""
    x = weights.astype(jnp.float32)
    mean = jnp.mean(x, axis=-1, keepdims=True)
    var = jnp.mean((x - mean) ** 2, axis=-1, keepdims=True)
    return ((x - mean) / jnp.sqrt(var + _EPS)).astype(weights.dtype)


def insnorm1d(weights: jax.Array, *, force_pallas: bool = False,
              max_block_bytes: int | None = None) -> jax.Array:
    """Pallas implementation of InsNorm1d.forward for a (bs, n) input."""
    bs, n = weights.shape
    dtype = weights.dtype
    itemsize = jnp.dtype(dtype).itemsize

    # Tiny-input fast path: custom-call + grid-step overhead dominates below ~1 MiB.
    if not force_pallas and bs * n * itemsize < _FAST_PATH_BYTES:
        return jnp.squeeze(_reference(weights))

    target_bytes, vmem_limit = _device_budgets(itemsize)
    if max_block_bytes is not None:
        target_bytes = int(max_block_bytes)
    tb, tn = _choose_tiles(bs, n, itemsize, target_bytes)

    if tn == n:
        # ---- Row-resident path: one pallas_call, full row per block. ---------- #
        grid = (pl.cdiv(bs, tb),)
        out = pl.pallas_call(
            _insnorm1d_kernel,
            out_shape=jax.ShapeDtypeStruct((bs, n), dtype),
            grid_spec=pltpu.PrefetchScalarGridSpec(
                num_scalar_prefetch=0,
                grid=grid,
                in_specs=[pl.BlockSpec((tb, n), lambda i: (i, 0))],
                out_specs=pl.BlockSpec((tb, n), lambda i: (i, 0)),
            ),
            compiler_params=pltpu.CompilerParams(
                dimension_semantics=("parallel",),
                vmem_limit_bytes=vmem_limit,
            ),
            cost_estimate=pl.CostEstimate(
                flops=7 * bs * n,
                transcendentals=bs,
                bytes_accessed=2 * bs * n * itemsize,
            ),
        )(weights)
    else:
        # ---- Lane-tiled path for very long rows: stats pass + normalize pass. - #
        nb = pl.cdiv(bs, tb)
        nl = pl.cdiv(n, tn)
        mean, rstd = pl.pallas_call(
            functools.partial(_stats_kernel, n=n, tn=tn),
            out_shape=(jax.ShapeDtypeStruct((bs, 1), jnp.float32),
                       jax.ShapeDtypeStruct((bs, 1), jnp.float32)),
            grid_spec=pltpu.PrefetchScalarGridSpec(
                num_scalar_prefetch=0,
                grid=(nb, nl),
                in_specs=[pl.BlockSpec((tb, tn), lambda i, j: (i, j))],
                out_specs=[pl.BlockSpec((tb, 1), lambda i, j: (i, 0)),
                           pl.BlockSpec((tb, 1), lambda i, j: (i, 0))],
            ),
            compiler_params=pltpu.CompilerParams(
                dimension_semantics=("parallel", "arbitrary"),
                vmem_limit_bytes=vmem_limit,
            ),
            cost_estimate=pl.CostEstimate(
                flops=3 * bs * n,
                transcendentals=bs,
                bytes_accessed=bs * n * itemsize,
            ),
        )(weights)
        out = pl.pallas_call(
            _normalize_kernel,
            out_shape=jax.ShapeDtypeStruct((bs, n), dtype),
            grid_spec=pltpu.PrefetchScalarGridSpec(
                num_scalar_prefetch=0,
                grid=(nb, nl),
                in_specs=[pl.BlockSpec((tb, tn), lambda i, j: (i, j)),
                          pl.BlockSpec((tb, 1), lambda i, j: (i, 0)),
                          pl.BlockSpec((tb, 1), lambda i, j: (i, 0))],
                out_specs=pl.BlockSpec((tb, tn), lambda i, j: (i, j)),
            ),
            compiler_params=pltpu.CompilerParams(
                dimension_semantics=("parallel", "parallel"),
                vmem_limit_bytes=vmem_limit,
            ),
            cost_estimate=pl.CostEstimate(
                flops=3 * bs * n,
                transcendentals=0,
                bytes_accessed=2 * bs * n * itemsize,
            ),
        )(weights, mean, rstd)

    # PyTorch: view(bs,1,n) -> InstanceNorm1d -> .squeeze()  (drops all size-1 dims).
    return jnp.squeeze(out)


# ----------------------------------------------------------------------------- #
# Self-test
# ----------------------------------------------------------------------------- #
if __name__ == "__main__":
    key = jax.random.PRNGKey(0)
    k1, k2, k3, k4, k5 = jax.random.split(key, 5)

    # 1) Module-sized input (bs=2, n=16): fast path and forced-Pallas path.
    w1 = jax.random.normal(k1, (2, 16), dtype=jnp.float32)
    ref1 = jnp.squeeze(_reference(w1))
    y1 = insnorm1d(w1)
    y1p = insnorm1d(w1, force_pallas=True)
    jax.block_until_ready((y1, y1p))
    assert y1.shape == (2, 16) and y1p.shape == (2, 16)
    assert jnp.allclose(y1, ref1, atol=1e-5, rtol=1e-5)
    assert jnp.allclose(y1p, ref1, atol=1e-5, rtol=1e-5)

    # 2) bs == 1 squeeze semantics: output drops the batch dim.
    w2 = jax.random.normal(k2, (1, 32), dtype=jnp.float32)
    y2 = insnorm1d(w2)
    jax.block_until_ready(y2)
    assert y2.shape == (32,)
    assert jnp.allclose(y2, jnp.squeeze(_reference(w2)), atol=1e-5, rtol=1e-5)

    # 3) Row-resident Pallas path: >= 2 grid steps, partial last batch tile.
    w3 = jax.random.normal(k3, (300, 1024), dtype=jnp.float32)
    y3 = insnorm1d(w3)
    jax.block_until_ready(y3)
    assert y3.shape == (300, 1024)
    assert jnp.allclose(y3, _reference(w3), atol=1e-5, rtol=1e-5)

    # 4) Lane-tiled (long-row) path, forced via a small per-block byte budget;
    #    exercises the column mask on a partial final lane tile.
    w4 = jax.random.normal(k4, (32, 4000), dtype=jnp.float32)
    y4 = insnorm1d(w4, force_pallas=True, max_block_bytes=64 * 1024)
    jax.block_until_ready(y4)
    assert y4.shape == (32, 4000)
    assert jnp.allclose(y4, _reference(w4), atol=1e-4, rtol=1e-4)

    # 5) bf16 input (in-dtype normalize branch), loose tolerance vs f32 reference.
    w5 = jax.random.normal(k5, (160, 1536), dtype=jnp.float32).astype(jnp.bfloat16)
    y5 = insnorm1d(w5, force_pallas=True)
    jax.block_until_ready(y5)
    assert y5.shape == (160, 1536) and y5.dtype == jnp.bfloat16
    assert jnp.allclose(y5.astype(jnp.float32),
                        _reference(w5.astype(jnp.float32)), atol=0.1, rtol=0.1)

    print("KERNEL_OK")
</pallas_src>

<mosaic_0001>
module attributes {stable_mosaic.version = 11 : i64} {
  func.func @_insnorm1d_kernel(%arg0: i32, %arg1: memref<2x16xf32, #tpu.memory_space<vmem>>, %arg2: memref<2x16xf32, #tpu.memory_space<vmem>>) attributes {dimension_semantics = [#tpu.dimension_semantics<parallel>], iteration_bounds = array<i64: 1>, scalar_prefetch = 0 : i64, scratch_operands = 0 : i64, tpu.core_type = #tpu.core_type<tc>, window_params = [{transform_indices = @transform_0, window_bounds = array<i64: 2, 16>}, {transform_indices = @transform_1, window_bounds = array<i64: 2, 16>}]} {
    %c0 = arith.constant 0 : index
    %c0_0 = arith.constant 0 : index
    %0 = vector.load %arg1[%c0, %c0_0] : memref<2x16xf32, #tpu.memory_space<vmem>>, vector<2x16xf32>
    %cst = arith.constant dense<0.000000e+00> : vector<2xf32>
    %1 = vector.multi_reduction <add>, %0, %cst [1] : vector<2x16xf32> to vector<2xf32>
    %2 = vector.shape_cast %1 : vector<2xf32> to vector<2x1xf32>
    %cst_1 = arith.constant 6.250000e-02 : f32
    %3 = vector.broadcast %cst_1 : f32 to vector<2x1xf32>
    %4 = arith.mulf %2, %3 : vector<2x1xf32>
    %5 = vector.broadcast %4 : vector<2x1xf32> to vector<2x16xf32>
    %6 = arith.subf %0, %5 : vector<2x16xf32>
    %7 = arith.mulf %6, %6 : vector<2x16xf32>
    %cst_2 = arith.constant dense<0.000000e+00> : vector<2xf32>
    %8 = vector.multi_reduction <add>, %7, %cst_2 [1] : vector<2x16xf32> to vector<2xf32>
    %9 = vector.shape_cast %8 : vector<2xf32> to vector<2x1xf32>
    %cst_3 = arith.constant 6.250000e-02 : f32
    %10 = vector.broadcast %cst_3 : f32 to vector<2x1xf32>
    %11 = arith.mulf %9, %10 : vector<2x1xf32>
    %cst_4 = arith.constant 9.99999974E-6 : f32
    %12 = vector.broadcast %cst_4 : f32 to vector<2x1xf32>
    %13 = arith.addf %11, %12 : vector<2x1xf32>
    %14 = math.rsqrt %13 : vector<2x1xf32>
    %15 = vector.broadcast %14 : vector<2x1xf32> to vector<2x16xf32>
    %16 = arith.mulf %6, %15 : vector<2x16xf32>
    %c0_5 = arith.constant 0 : index
    %c0_6 = arith.constant 0 : index
    %17 = vector.load %arg2[%c0_5, %c0_6] : memref<2x16xf32, #tpu.memory_space<vmem>>, vector<2x16xf32>
    tpu.vector_store %arg2[%c0_5, %c0_6], %16 {strides = array<i32>} : memref<2x16xf32, #tpu.memory_space<vmem>>, vector<2x16xf32>,
    return
  }
  func.func @transform_0(%arg0: i32) -> (i32, i32) {
    %c0_i32 = arith.constant 0 : i32
    %c0_i32_0 = arith.constant 0 : i32
    return %arg0, %c0_i32 : i32, i32
  }
  func.func @transform_1(%arg0: i32) -> (i32, i32) {
    %c0_i32 = arith.constant 0 : i32
    %c0_i32_0 = arith.constant 0 : i32
    return %arg0, %c0_i32 : i32, i32
  }
}

</mosaic_0001>

<bundles_post_ra>
// kernel: tpu_custom_call.1
= control target key start
LH: loop header
LB: loop body
LE: loop exit
PB: predicated region body
PF: predicated region fallthrough
CT: control target
= control target key end

     0   :  { %6 = vsyncpa [#allocation3], 0  ;;  %s143_s0 = inlined_call_operand.hbm [shape: f32[2,16], index: 0, kind: input, shape index: {}]   ;;  %s144_s1 = inlined_call_operand.hbm [shape: f32[2,16], index: 1, kind: output, shape index: {}]  }
   0x1   :  { %7 = vsyncpa [#allocation4], 0  ;;  %s104_s6 = smov [#allocation2]   ;;  %s56_s10 = scalar_lea.hbm %s143_s0, 32 }
   0x2   :  { %s14_s7 = sshll.u32 %s104_s6, 4  ;;  %p57_p0 = scmp.ne.s32.totalorder %s143_s0, %s56_s10  ;;  %s15_s7 = int_to_ptr.vmem [resolvable:$true] %s14_s7 }
   0x3   :  { %p60_p1 = scmp.lt.u32.totalorder %s56_s10, %s143_s0 }
   0x5   :  { %p62_p2 = pnand %p60_p1, %p57_p0 }
   0x7   :  { %65 = shalt.err (!%p62_p2)
}
   0x8   :  { %s66_s15 = scalar_lea.vmem %s15_s7, 32  ;;  %p71_p4 = scmp.lt.s32.totalorder %s15_s7, %s15_s7 }
   0x9   :  { %p67_p3 = scmp.ne.s32.totalorder %s15_s7, %s66_s15  ;;  %p72_p5 = scmp.lt.s32.totalorder %s66_s15, %s66_s15 }
   0xb   :  { %p73_p6 = por %p72_p5, %p71_p4 }
   0xd   :  { %p74_p7 = pnand %p73_p6, %p67_p3 }
   0xf   :  { %77 = shalt.err (!%p74_p7)
}
  0x10   :  { %17 = dma.hbm_to_vmem [thread:$0]  %s143_s0, 32, %s15_s7, [#allocation3]  }
  0x11   :  { %100 = dma.done.wait [#allocation3], 32  }
  0x12   :  { %101 = vsyncadd [#allocation3], 4294967264  ;;  %vm22_vm0 = vcmask 123904   ;;  %v21_v0 = vld [vmem:[#allocation2] sm:$0x3]  ;;  %s105_s18 = smov [#allocation5]  }
  0x13   :  { %v23_v1 = vsel %vm22_vm0, %v21_v0, 0.0  ;;  %s43_s0 = sshll.u32 %s105_s18, 4  ;;  %s44_s0 = int_to_ptr.vmem [resolvable:$true] %s43_s0 }
  0x14   :  { %24 = vadd.xlane.f32.xlu0 %v23_v1  ;;  %s78_s19 = scalar_lea.vmem %s44_s0, 32  ;;  %p83_p9 = scmp.lt.s32.totalorder %s44_s0, %s44_s0 }
  0x15   :  { %p79_p8 = scmp.ne.s32.totalorder %s44_s0, %s78_s19  ;;  %p84_p10 = scmp.lt.s32.totalorder %s78_s19, %s78_s19 }
  0x17   :  { %p85_p11 = por %p84_p10, %p83_p9 }
  0x19   :  { %p86_p12 = pnand %p85_p11, %p79_p8 }
  0xa1   :  { %v25_v2 = vpop.xlane.xlu0 %24 }
  0xa2   :  { %v26_v3 = vmul.f32 0.0625, %v25_v2 }
  0xa4   :  { %v27_v4 = vsub.f32 %v21_v0, %v26_v3 }
  0xa6   :  { %v28_v5 = vmul.f32 %v27_v4, %v27_v4 }
  0xa8   :  { %v29_v6 = vsel %vm22_vm0, %v28_v5, 0.0 }
  0xa9   :  { %30 = vadd.xlane.f32.xlu0 %v29_v6 }
 0x136   :  { %v31_v7 = vpop.xlane.xlu0 %30 }
 0x137   :  { %v32_v8 = vmul.f32 0.0625, %v31_v7 }
 0x139   :  { %v33_v9 = vadd.f32 1e-05, %v32_v8 }
 0x13b   :  { %54 = vrsqrt.f32 %v33_v9 }
 0x145   :  { %v55_v10 = vpop.eup %54 }
 0x146   :  { %v35_v11 = vmul.f32 %v55_v10, %v27_v4 }
 0x148   :  { %36 = vst.msk [vmem:[#allocation5] sm:$0x3] %vm22_vm0, %v35_v11 }
 0x149   :  { %89 = shalt.err (!%p86_p12)
}
 0x14a   :  { %s90_s22 = scalar_lea.hbm %s144_s1, 32 }
 0x14b   :  { %p91_p13 = scmp.ne.s32.totalorder %s144_s1, %s90_s22  ;;  %p94_p0 = scmp.lt.u32.totalorder %s90_s22, %s144_s1 }
 0x14d   :  { %p96_p1 = pnand %p94_p0, %p91_p13 }
 0x14f   :  { %99 = shalt.err (!%p96_p1)
}
 0x150   :  { %46 = dma.vmem_to_hbm [thread:$0]  %s44_s0, 32, %s144_s1, [#allocation4]  }
 0x151   :  { %102 = dma.done.wait [#allocation4], 32  }
 0x152   :  { %103 = vsyncadd [#allocation4], 4294967264 }
 0x153   :  { %50 = vsyncpa [#allocation3], 1 }
 0x154   :  { %51 = vsyncpa [#allocation4], 1 }

</bundles_post_ra>
